<compile_context>
chip_gen: v7x
topology: tpu7x:2x2x1
jax: 0.10.0
libtpu: 0.0.40
codegen_flags: <defaults>
</compile_context>

<pallas_src>
import functools
import math

import jax
import jax.numpy as jnp
from jax import lax
from jax.experimental import pallas as pl
from jax.experimental.pallas import tpu as pltpu

_LANE = 128


def _cdiv(a, b):
    return -(-a // b)


def _default_num_chunks():
    # v7x has 2 TensorCores sharing HBM -> two parallel streams saturate BW.
    # v5e / v6e have a single TC: a chunk axis would only add rounding waste.
    try:
        kind = jax.devices()[0].device_kind.lower()
    except Exception:
        return 1
    return 2 if "v7" in kind else 1


def _recon_kernel(x_ref, t_ref, o_ref, acc_ref, *, losstype, eps,
                  tiles_per_chunk, total_tiles, tail_valid_rows):
    # x_ref, t_ref: (tr, 128) streamed tiles.
    # o_ref:  (1, 1, 128) per-lane partial sums for this chunk.
    # acc_ref: (8, 128) f32 VMEM scratch, resident across the k axis.
    i = pl.program_id(0)          # chunk (one per TensorCore)
    k = pl.program_id(1)          # reduction step within the chunk
    tile_idx = i * tiles_per_chunk + k

    @pl.when(k == 0)
    def _init():
        acc_ref[...] = jnp.zeros_like(acc_ref)

    d = x_ref[...].astype(jnp.float32) - t_ref[...].astype(jnp.float32)
    sq = d * d
    if losstype == "l2":
        contrib = sq
    else:                                           # 'l1' (charbonnier-style)
        contrib = jnp.sqrt(sq + eps)

    def _accumulate(values):
        # Fold the (tr, 128) tile into the (8, 128) accumulator with plain
        # full-vreg VALU adds; the cross-sublane (XLU) reduce happens only
        # once per chunk, in the finalize step below.
        acc_ref[...] += values.reshape(-1, 8, _LANE).sum(axis=0)

    if tail_valid_rows is not None:
        # The last logical tile is ragged: Pallas does not zero the OOB rows
        # of a partial block, so mask them (last step only).
        @pl.when(tile_idx == total_tiles - 1)
        def _tail():
            row_ids = lax.broadcasted_iota(jnp.int32, contrib.shape, 0)
            _accumulate(jnp.where(row_ids < tail_valid_rows, contrib, 0.0))

        @pl.when(tile_idx < total_tiles - 1)
        def _full():
            _accumulate(contrib)
    else:
        # Skip the (at most one) dead pipeline step of the last chunk.
        @pl.when(tile_idx < total_tiles)
        def _full():
            _accumulate(contrib)

    @pl.when(k == pl.num_programs(1) - 1)
    def _finalize():
        o_ref[...] = jnp.sum(acc_ref[...], axis=0,
                             keepdims=True).reshape(1, 1, _LANE)


def reconstruction_loss(x, target, losstype="l2", eps=1e-6,
                        tile_rows=4096, num_chunks=None):
    """Pallas equivalent of ReconstructionLoss.forward. Returns a scalar."""
    if losstype not in ("l2", "l1"):
        print("reconstruction loss type error!")
        return 0
    assert x.shape == target.shape, (x.shape, target.shape)

    n_batch = x.shape[0]
    total = x.size
    itemsize = jnp.dtype(x.dtype).itemsize

    # dtype-aware sublane packing: f32 -> 8 rows, bf16 -> 16, int8/fp8 -> 32.
    align = max(8, 32 // max(itemsize, 1))

    xf = x.reshape(-1)
    tf = target.reshape(-1)
    # Only a ragged sub-128-element tail (rare) needs host-side zero padding;
    # the typical N*C*H*W % 128 == 0 case streams both arrays with no copy.
    pad = (-total) % _LANE
    if pad:
        xf = jnp.pad(xf, (0, pad))
        tf = jnp.pad(tf, (0, pad))
    rows = (total + pad) // _LANE
    xf = xf.reshape(rows, _LANE)
    tf = tf.reshape(rows, _LANE)

    # Largest aligned tile not exceeding the stream (~2 MiB f32 blocks).
    tr = max(align, (min(int(tile_rows), rows) // align) * align)
    tiles = _cdiv(rows, tr)

    # One stream per TensorCore.
    if num_chunks is None:
        num_chunks = _default_num_chunks()
    n_chunks = max(1, min(int(num_chunks), tiles))
    tiles_per_chunk = _cdiv(tiles, n_chunks)

    tail_rows = rows - (tiles - 1) * tr           # valid rows of the last tile
    tail_valid_rows = tail_rows if tail_rows != tr else None

    kernel = functools.partial(
        _recon_kernel, losstype=losstype, eps=float(eps),
        tiles_per_chunk=tiles_per_chunk, total_tiles=tiles,
        tail_valid_rows=tail_valid_rows)

    if n_chunks * tiles_per_chunk == tiles:
        in_map = lambda i, k: (i * tiles_per_chunk + k, 0)
    else:
        # Clamp the dead step(s) of the last chunk so the DMA stays in bounds;
        # the kernel skips their contribution.
        in_map = lambda i, k: (jnp.minimum(i * tiles_per_chunk + k, tiles - 1), 0)

    cost = pl.CostEstimate(
        flops=3 * rows * _LANE,
        transcendentals=(rows * _LANE if losstype == "l1" else 0),
        bytes_accessed=2 * rows * _LANE * itemsize + n_chunks * _LANE * 4,
    )

    partials = pl.pallas_call(
        kernel,
        out_shape=jax.ShapeDtypeStruct((n_chunks, 1, _LANE), jnp.float32),
        grid=(n_chunks, tiles_per_chunk),
        in_specs=[
            pl.BlockSpec((tr, _LANE), in_map),
            pl.BlockSpec((tr, _LANE), in_map),
        ],
        out_specs=pl.BlockSpec((1, 1, _LANE), lambda i, k: (i, 0, 0)),
        scratch_shapes=[pltpu.VMEM((8, _LANE), jnp.float32)],
        compiler_params=pltpu.CompilerParams(
            dimension_semantics=("parallel", "arbitrary"),
            vmem_limit_bytes=32 * 1024 * 1024,
        ),
        cost_estimate=cost,
    )(xf, tf)

    total_sum = jnp.sum(partials)
    if losstype == "l1" and pad:
        # Each zero-padded element contributed exactly sqrt(eps); remove them.
        total_sum = total_sum - float(pad) * math.sqrt(eps)
    return total_sum / n_batch


def _reference(x, t, losstype, eps):
    d = x - t
    if losstype == "l2":
        return jnp.mean(jnp.sum(d * d, axis=(1, 2, 3)))
    return jnp.mean(jnp.sum(jnp.sqrt(d * d + eps), axis=(1, 2, 3)))


if __name__ == "__main__":
    key = jax.random.PRNGKey(0)
    eps = 1e-6

    # Case 1: multiple of a full tile (no tail mask).
    k1, k2, k3, k4 = jax.random.split(key, 4)
    x1 = jax.random.normal(k1, (2, 4, 16, 16), dtype=jnp.float32)
    t1 = jax.random.normal(k2, (2, 4, 16, 16), dtype=jnp.float32)

    # Case 2: exercises the ragged-last-tile mask (rows not a tile multiple).
    x2 = jax.random.normal(k3, (2, 3, 16, 16), dtype=jnp.float32)
    t2 = jax.random.normal(k4, (2, 3, 16, 16), dtype=jnp.float32)

    for (xx, tt) in ((x1, t1), (x2, t2)):
        out_l2 = jax.block_until_ready(
            reconstruction_loss(xx, tt, losstype="l2", eps=eps, tile_rows=8))
        ref_l2 = _reference(xx, tt, "l2", eps)
        assert out_l2.shape == (), out_l2.shape
        assert jnp.allclose(out_l2, ref_l2, atol=1e-4, rtol=1e-4), (out_l2, ref_l2)

        out_l1 = jax.block_until_ready(
            reconstruction_loss(xx, tt, losstype="l1", eps=eps, tile_rows=8))
        ref_l1 = _reference(xx, tt, "l1", eps)
        assert jnp.allclose(out_l1, ref_l1, atol=1e-4, rtol=1e-4), (out_l1, ref_l1)

    # Default (large) tile path on the canonical shape as well.
    out = jax.block_until_ready(reconstruction_loss(x1, t1, losstype="l2", eps=eps))
    assert jnp.allclose(out, _reference(x1, t1, "l2", eps), atol=1e-4, rtol=1e-4)

    print("KERNEL_OK")
</pallas_src>

<mosaic_0001>
module attributes {stable_mosaic.version = 11 : i64} {
  func.func @_recon_kernel(%arg0: i32, %arg1: i32, %arg2: memref<8x128xf32, #tpu.memory_space<vmem>>, %arg3: memref<8x128xf32, #tpu.memory_space<vmem>>, %arg4: memref<1x1x128xf32, #tpu.memory_space<vmem>>, %arg5: memref<8x128xf32, #tpu.memory_space<vmem>>) attributes {dimension_semantics = [#tpu.dimension_semantics<parallel>, #tpu.dimension_semantics<arbitrary>], iteration_bounds = array<i64: 1, 2>, scalar_prefetch = 0 : i64, scratch_operands = 1 : i64, tpu.core_type = #tpu.core_type<tc>, window_params = [{transform_indices = @transform_0, window_bounds = array<i64: 8, 128>}, {transform_indices = @transform_1, window_bounds = array<i64: 8, 128>}, {transform_indices = @transform_2, window_bounds = array<i64: 1, 1, 128>}]} {
    %c2_i32 = arith.constant 2 : i32
    %0 = arith.muli %arg0, %c2_i32 : i32
    %1 = arith.addi %0, %arg1 : i32
    %c0_i32 = arith.constant 0 : i32
    %2 = arith.cmpi eq, %arg1, %c0_i32 : i32
    %3 = arith.extui %2 : i1 to i32
    %c0_i32_0 = arith.constant 0 : i32
    %4 = arith.cmpi ne, %3, %c0_i32_0 : i32
    scf.if %4 {
      %cst = arith.constant 0.000000e+00 : f32
      %15 = vector.broadcast %cst : f32 to vector<8x128xf32>
      %c0_7 = arith.constant 0 : index
      %c0_8 = arith.constant 0 : index
      %16 = vector.load %arg5[%c0_7, %c0_8] : memref<8x128xf32, #tpu.memory_space<vmem>>, vector<8x128xf32>
      tpu.vector_store %arg5[%c0_7, %c0_8], %15 {strides = array<i32>} : memref<8x128xf32, #tpu.memory_space<vmem>>, vector<8x128xf32>,
    } else {
    }
    %c0 = arith.constant 0 : index
    %c0_1 = arith.constant 0 : index
    %5 = vector.load %arg2[%c0, %c0_1] : memref<8x128xf32, #tpu.memory_space<vmem>>, vector<8x128xf32>
    %c0_2 = arith.constant 0 : index
    %c0_3 = arith.constant 0 : index
    %6 = vector.load %arg3[%c0_2, %c0_3] : memref<8x128xf32, #tpu.memory_space<vmem>>, vector<8x128xf32>
    %7 = arith.subf %5, %6 : vector<8x128xf32>
    %8 = arith.mulf %7, %7 : vector<8x128xf32>
    %c2_i32_4 = arith.constant 2 : i32
    %9 = arith.cmpi slt, %1, %c2_i32_4 : i32
    %10 = arith.extui %9 : i1 to i32
    %c0_i32_5 = arith.constant 0 : i32
    %11 = arith.cmpi ne, %10, %c0_i32_5 : i32
    scf.if %11 {
      %c0_7 = arith.constant 0 : index
      %c0_8 = arith.constant 0 : index
      %15 = vector.load %arg5[%c0_7, %c0_8] : memref<8x128xf32, #tpu.memory_space<vmem>>, vector<8x128xf32>
      %16 = vector.shape_cast %8 : vector<8x128xf32> to vector<1x8x128xf32>
      %cst = arith.constant dense<0.000000e+00> : vector<8x128xf32>
      %17 = vector.multi_reduction <add>, %16, %cst [0] : vector<1x8x128xf32> to vector<8x128xf32>
      %18 = arith.addf %15, %17 : vector<8x128xf32>
      %c0_9 = arith.constant 0 : index
      %c0_10 = arith.constant 0 : index
      %19 = vector.load %arg5[%c0_9, %c0_10] : memref<8x128xf32, #tpu.memory_space<vmem>>, vector<8x128xf32>
      tpu.vector_store %arg5[%c0_9, %c0_10], %18 {strides = array<i32>} : memref<8x128xf32, #tpu.memory_space<vmem>>, vector<8x128xf32>,
    } else {
    }
    %c1_i32 = arith.constant 1 : i32
    %12 = arith.cmpi eq, %arg1, %c1_i32 : i32
    %13 = arith.extui %12 : i1 to i32
    %c0_i32_6 = arith.constant 0 : i32
    %14 = arith.cmpi ne, %13, %c0_i32_6 : i32
    scf.if %14 {
      %c0_7 = arith.constant 0 : index
      %c0_8 = arith.constant 0 : index
      %15 = vector.load %arg5[%c0_7, %c0_8] : memref<8x128xf32, #tpu.memory_space<vmem>>, vector<8x128xf32>
      %cst = arith.constant dense<0.000000e+00> : vector<128xf32>
      %16 = vector.multi_reduction <add>, %15, %cst [0] : vector<8x128xf32> to vector<128xf32>
      %17 = vector.shape_cast %16 : vector<128xf32> to vector<1x128xf32>
      %18 = vector.shape_cast %17 : vector<1x128xf32> to vector<1x1x128xf32>
      %c0_9 = arith.constant 0 : index
      %c0_10 = arith.constant 0 : index
      %c0_11 = arith.constant 0 : index
      %19 = vector.load %arg4[%c0_9, %c0_10, %c0_11] : memref<1x1x128xf32, #tpu.memory_space<vmem>>, vector<1x1x128xf32>
      tpu.vector_store %arg4[%c0_9, %c0_10, %c0_11], %18 {strides = array<i32>} : memref<1x1x128xf32, #tpu.memory_space<vmem>>, vector<1x1x128xf32>,
    } else {
    }
    return
  }
  func.func @transform_0(%arg0: i32, %arg1: i32) -> (i32, i32) {
    %c2_i32 = arith.constant 2 : i32
    %0 = arith.muli %arg0, %c2_i32 : i32
    %1 = arith.addi %0, %arg1 : i32
    %c0_i32 = arith.constant 0 : i32
    %c0_i32_0 = arith.constant 0 : i32
    return %1, %c0_i32 : i32, i32
  }
  func.func @transform_1(%arg0: i32, %arg1: i32) -> (i32, i32) {
    %c2_i32 = arith.constant 2 : i32
    %0 = arith.muli %arg0, %c2_i32 : i32
    %1 = arith.addi %0, %arg1 : i32
    %c0_i32 = arith.constant 0 : i32
    %c0_i32_0 = arith.constant 0 : i32
    return %1, %c0_i32 : i32, i32
  }
  func.func @transform_2(%arg0: i32, %arg1: i32) -> (i32, i32, i32) {
    %c0_i32 = arith.constant 0 : i32
    %c0_i32_0 = arith.constant 0 : i32
    %c0_i32_1 = arith.constant 0 : i32
    return %arg0, %c0_i32, %c0_i32_0 : i32, i32, i32
  }
}

</mosaic_0001>

<bundles_post_ra>
// kernel: tpu_custom_call.1
= control target key start
LH: loop header
LB: loop body
LE: loop exit
PB: predicated region body
PF: predicated region fallthrough
CT: control target
= control target key end

     0   :  { %7 = vsyncpa [#allocation4], 0  ;;  %s795_s0 = inlined_call_operand.hbm [shape: f32[16,128], index: 0, kind: input, shape index: {}]   ;;  %s796_s1 = inlined_call_operand.hbm [shape: f32[16,128], index: 1, kind: input, shape index: {}]   ;;  %s797_s2 = inlined_call_operand.hbm [shape: f32[1,1,128], index: 2, kind: output, shape index: {}]  }
   0x1   :  { %9 = vsyncpa [#allocation4 + $0x1], 0 }
   0x2   :  { %10 = vsyncpa [#allocation7], 0 }
   0x3   :  { %12 = vsyncpa [#allocation7 + $0x1], 0 }
   0x4   :  { %13 = vsyncpa [#allocation5], 0  ;;  %s595_s9 = smov 0   ;;  %s597_s10 = smov 0  }
   0x5   :  { %s599_s11 = smov 0   ;;  %s601_s12 = smov 0  }
   0x6   :  { %s603_s13 = smov 0   ;;  %s605_s14 = smov 0  }
   0x7 LB: > { %s345_s15 = sadd.s32 4294967295, %s574_s14   ;;  %s28_s16 = sadd.s32 1, %s570_s13  ;;  %s574_s14 = sphi %s605_s14, %s19_s14   ;;  %s570_s13 = sphi %s603_s13, %s812_s13   ;;  %s566_s12 = sphi %s601_s12, %s811_s12   ;;  %s562_s11 = sphi %s599_s11, %s810_s11   ;;  %s558_s10 = sphi %s597_s10, %s809_s10   ;;  %s554_s9 = sphi %s595_s9, %s808_s9  }
   0x8   : > { %p29_p0 = scmp.ge.s32.totalorder %s28_s16, 2  ;;  %s42_s17 = sadd.s32 1, %s562_s11 }
   0x9   : > { %p49_p1 = scmp.ne.s32.totalorder %s562_s11, %s558_s10  ;;  %p50_p2 = scmp.eq.s32.totalorder %s574_s14, 0 }
   0xa   : > { %s814_s16 = smov (%p29_p0, %s28_s16), 0  ;;  %p55_p4 = scmp.ne.s32.totalorder %s558_s10, %s554_s9 }
   0xb   : > { %p631_p3 = por %p50_p2, %p49_p1  ;;  %s39_s19 = ssub.s32 %s570_s13, %s814_s16 }
   0xc   : > { %p56_p5 = scmp.eq.s32.totalorder %s345_s15, 0  ;;  %p40_p6 = scmp.eq.s32.totalorder %s39_s19, 0 }
   0xd   : > { %p377_p8 = scmp.lt.s32.totalorder %s574_s14, 2  ;;  %s649_s22 = sand.u32 1, %s562_s11  }
   0xe   : > { %p640_p7 = por %p56_p5, %p55_p4  ;;  %s349_s23 = sshll.u32 %s570_s13, 7 }
   0xf   : > { %s646_s21 = scalar_select %p40_p6, %s562_s11, %s42_s17  }
  0x10   : > { %s800_s20 = scalar_select %p640_p7, 1, 0 }
  0x11   : > { %s348_s24 = sshll.u32 %s649_s22, 3  ;;  %s658_s27 = scalar_lea.hbm %s795_s0, %s349_s23 }
  0x12   : > { %s139_s28 = scalar_lea.vmem [#allocation3], %s348_s24  ;;  %p664_p9 = pnand %p377_p8, %p631_p3 }
  0x13   : > { %s148_s29 = sshll.u32 %s139_s28, 4  ;;  %s136_s3 = scalar_lea.sflag [#allocation4], %s649_s22  ;;  %s668_s29 = int_to_ptr.vmem [resolvable:$true] %s148_s29 }
  0x14   : > { %s430_s4 = scalar_lea.hbm %s658_s27, 128  ;;  %p432_p13 = pneg %p664_p9 }
  0x15   : > { %p431_p12 = scmp.ne.s32.totalorder %s658_s27, %s430_s4  ;;  %s435_s7 = scalar_lea.hbm %s795_s0, 256 }
  0x16   : > { %p436_p2 = scmp.lt.u32.totalorder %s658_s27, %s795_s0  ;;  %p437_p3 = scmp.lt.u32.totalorder %s435_s7, %s430_s4 }
  0x17   : > { %p433_p0 = pnand %p432_p13, %p431_p12  ;;  %p439_p5 = scmp.lt.u32.totalorder %s430_s4, %s658_s27 }
  0x18   : > { %p438_p4 = por %p437_p3, %p436_p2 }
  0x19   : > { %p434_p1 = pneg %p433_p0 }
  0x1a   : > { %p440_p6 = por %p439_p5, %p438_p4 }
  0x1c   : > { %p441_p8 = pnand %p440_p6, %p434_p1 }
  0x1e   : > { %444 = shalt.err (!%p441_p8)
}
  0x1f   : > { %s445_s17 = scalar_lea.vmem %s668_s29, 128  ;;  %s576_s18 = smov [#allocation3]  }
  0x20   : > { %p446_p12 = scmp.ne.s32.totalorder %s668_s29, %s445_s17  ;;  %s450_s19 = sshll.u32 %s576_s18, 4  ;;  %s451_s19 = int_to_ptr.vmem [resolvable:$false] %s450_s19 }
  0x21   : > { %s452_s25 = scalar_lea.vmem %s451_s19, 256  ;;  %p453_p11 = scmp.lt.s32.totalorder %s668_s29, %s451_s19 }
  0x22   : > { %p448_p0 = pnand %p446_p12, %p432_p13  ;;  %p454_p2 = scmp.lt.s32.totalorder %s452_s25, %s445_s17 }
  0x24   : > { %p449_p10 = pneg %p448_p0  ;;  %p455_p3 = por %p454_p2, %p453_p11 }
  0x26   : > { %p456_p4 = pnand %p455_p3, %p449_p10 }
  0x28   : > { %459 = shalt.err (!%p456_p4)
}
  0x29   : > { %373 = dma.hbm_to_vmem [thread:$0]  (!%p664_p9), %s658_s27, 128, %s668_s29, %s136_s3  }
  0x2a   : > { %p802_p1 = scmp.lt.s32.totalorder %s574_s14, 3  ;;  %p803_p5 = scmp.ge.s32.totalorder %s574_s14, 1 }
  0x2b   : > { %s711_s5 = scalar_lea.hbm %s796_s1, %s349_s23  ;;  %s159_s6 = scalar_lea.vmem [#allocation6], %s348_s24 }
  0x2c   : > { %p702_p6 = pnand %p803_p5, %p802_p1  ;;  %s168_s7 = sshll.u32 %s159_s6, 4  ;;  %s169_s7 = int_to_ptr.vmem [resolvable:$true] %s168_s7 }
  0x2d   : > { %s156_s27 = scalar_lea.sflag [#allocation7], %s649_s22  ;;  %s460_s29 = scalar_lea.hbm %s711_s5, 128 }
  0x2e   : > { %s804_s26 = scalar_select %p702_p6, 1, 0 }
  0x2f   : > { %p461_p10 = scmp.ne.s32.totalorder %s711_s5, %s460_s29  ;;  %s465_s23 = scalar_lea.hbm %s796_s1, 256 }
  0x30   : > { %p466_p12 = scmp.lt.u32.totalorder %s711_s5, %s796_s1  ;;  %p467_p0 = scmp.lt.u32.totalorder %s465_s23, %s460_s29 }
  0x31   : > { %p463_p11 = pnand %p461_p10, %p432_p13  ;;  %p469_p3 = scmp.lt.u32.totalorder %s460_s29, %s711_s5 }
  0x32   : > { %p468_p2 = por %p467_p0, %p466_p12 }
  0x33   : > { %p464_p8 = pneg %p463_p11 }
  0x34   : > { %p470_p4 = por %p469_p3, %p468_p2 }
  0x36   : > { %p471_p1 = pnand %p470_p4, %p464_p8 }
  0x38   : > { %474 = shalt.err (!%p471_p1)
}
  0x39   : > { %s475_s22 = scalar_lea.vmem %s169_s7, 128  ;;  %s577_s24 = smov [#allocation6]  }
  0x3a   : > { %p476_p5 = scmp.ne.s32.totalorder %s169_s7, %s475_s22  ;;  %s480_s18 = sshll.u32 %s577_s24, 4  ;;  %s481_s18 = int_to_ptr.vmem [resolvable:$false] %s480_s18 }
  0x3b   : > { %s482_s19 = scalar_lea.vmem %s481_s18, 256  ;;  %p483_p7 = scmp.lt.s32.totalorder %s169_s7, %s481_s18 }
  0x3c   : > { %p478_p10 = pnand %p476_p5, %p432_p13  ;;  %p484_p6 = scmp.lt.s32.totalorder %s482_s19, %s475_s22 }
  0x3e   : > { %p479_p11 = pneg %p478_p10  ;;  %p485_p0 = por %p484_p6, %p483_p7 }
  0x40   : > { %p486_p12 = pnand %p485_p0, %p479_p11 }
  0x42   : > { %489 = shalt.err (!%p486_p12)
}
  0x43   : > { %376 = dma.hbm_to_vmem [thread:$0]  (!%p664_p9), %s711_s5, 128, %s169_s7, %s156_s27  }
  0x44   : > { %p805_p8 = scmp.ne.s32.totalorder %s804_s26, 0 }
  0x45   : > { %s179_s25 = sand.u32 (!%p805_p8), 1, %s558_s10   ;;  %p806_p13 = scmp.ne.s32.totalorder (!%p805_p8), %s800_s20, 0 }
  0x46   : > { %177 = sbr.rel (%p805_p8) target bundleno = 142 (0x8e), region = 28  ;;  %s353_s28 = sshll.u32 (!%p805_p8), %s179_s25, 3 }
  0x47   : > { %s180_s4 = scalar_lea.sflag (!%p805_p8), [#allocation4], %s179_s25  ;;  %s183_s6 = scalar_lea.vmem (!%p805_p8), [#allocation3], %s353_s28 }
  0x4d   : > { %541 = dma.done.wait (%p806_p13), %s180_s4, 128  }
  0x4e   : > { %543 = vsyncadd (%p806_p13), %s180_s4, 4294967168  ;;  %s189_s29 = scalar_lea.sflag [#allocation7], %s179_s25  ;;  %s192_s3 = scalar_lea.vmem [#allocation6], %s353_s28 }
  0x4f   : > { %545 = dma.done.wait (%p806_p13), %s189_s29, 128  }
  0x50   : > { %547 = vsyncadd (%p806_p13), %s189_s29, 4294967168  ;;  %p355_p7 = scmp.ne.s32.totalorder %s566_s12, 0 }
  0x51   : > { %v578_v0 = vmov (!%p355_p7), 0.0  }
  0x52   : > { %222 = sbr.rel (%p355_p7) target bundleno = 89 (0x59), region = 40  ;;  %223 = vst [vmem:[#allocation2] sm:$0xff] (!%p355_p7), %v578_v0 }
  0x59 PF: > { %v224_v1 = vld [vmem:[%s183_s6] sm:$0xff]  ;;  %v225_v2 = vld [vmem:[%s192_s3] sm:$0xff]  ;;  %p356_p9 = scmp.ge.s32.totalorder %s566_s12, 2 }
  0x5a   : > { %v226_v3 = vsub.f32 %v224_v1, %v225_v2  ;;  %v232_v5 = vld [vmem:[#allocation2] sm:$0xff] (!%p356_p9) }
  0x5b   : > { %231 = sbr.rel (%p356_p9) target bundleno = 98 (0x62), region = 44 }
  0x5c   : > { %v227_v4 = vmul.f32 %v226_v3, %v226_v3 }
  0x5e   : > { %v234_v6 = vadd.f32 (!%p356_p9), %v232_v5, %v227_v4 }
  0x60   : > { %235 = vst [vmem:[#allocation2] sm:$0xff] (!%p356_p9), %v234_v6 }
  0x62 PF: > { %p357_p6 = scmp.ne.s32.totalorder %s566_s12, 1 }
  0x64   : > { %239 = sbr.rel (%p357_p6) target bundleno = 117 (0x75), region = 48 }
  0x67   : > { %v240_v7 = vld [vmem:[#allocation2] sm:$0xff] (!%p357_p6) }
  0x68   : > { %v241_v8 = vrot.slane (!%p357_p6), %v240_v7, 4 }
  0x6a   : > { %v242_v9 = vadd.f32 (!%p357_p6), %v241_v8, %v240_v7 }
  0x6c   : > { %v243_v10 = vrot.slane %v242_v9, 2 }
  0x6e   : > { %v244_v11 = vadd.f32 %v243_v10, %v242_v9 }
  0x70   : > { %v245_v12 = vrot.slane %v244_v11, 1 }
  0x72   : > { %v246_v13 = vadd.f32 %v245_v12, %v244_v11 }
  0x74   : > { %247 = vst [vmem:[#allocation8] sm:$0x1] %v246_v13 }
  0x75 PF: > { %p751_p2 = scmp.eq.s32.totalorder %s345_s15, 1  ;;  %s579_s30 = smov [#allocation8]  }
  0x76   : > { %s257_s26 = sshll.u32 %s579_s30, 4  ;;  %s258_s26 = int_to_ptr.vmem [resolvable:$true] %s257_s26 }
  0x77   : > { %s490_s12 = scalar_lea.vmem %s258_s26, 16  ;;  %s496_s5 = scalar_lea.vmem %s258_s26, 32 }
  0x78   : > { %p491_p3 = scmp.ne.s32.totalorder %s258_s26, %s490_s12  ;;  %p497_p5 = scmp.lt.s32.totalorder %s258_s26, %s258_s26 }
  0x79   : > { %p498_p10 = scmp.lt.s32.totalorder %s496_s5, %s490_s12 }
  0x7a   : > { %p492_p4 = pnand %p491_p3, %p751_p2 }
  0x7b   : > { %p499_p11 = por %p498_p10, %p497_p5 }
  0x7c   : > { %p493_p1 = pneg %p492_p4 }
  0x7e   : > { %p500_p0 = pnand %p499_p11, %p493_p1 }
  0x80   : > { %503 = shalt.err (!%p500_p0)
}
  0x81   : > { %s504_s27 = scalar_lea.hbm %s797_s2, 16 }
  0x82   : > { %p505_p12 = scmp.ne.s32.totalorder %s797_s2, %s504_s27  ;;  %p510_p7 = scmp.lt.u32.totalorder %s504_s27, %s797_s2 }
  0x84   : > { %p506_p8 = pnand %p505_p12, %p751_p2 }
  0x86   : > { %p507_p13 = pneg %p506_p8 }
  0x88   : > { %p512_p9 = pnand %p510_p7, %p507_p13 }
  0x8a   : > { %515 = shalt.err (!%p512_p9)
}
  0x8b   : > { %367 = dma.vmem_to_hbm [thread:$0]  (%p751_p2), %s258_s26, 16, %s797_s2, [#allocation5]  }
  0x8c   : > { %549 = dma.done.wait (%p751_p2), [#allocation5], 16  }
  0x8d   : > { %551 = vsyncadd (%p751_p2), [#allocation5], 4294967280 }
  0x8e PF: > { %s19_s14 = sadd.s32 1, %s574_s14   ;;  %s808_s9 = smov %s558_s10 }
  0x8f   : > { %p16_p6 = scmp.ge.s32.totalorder %s19_s14, 4   ;;  %s809_s10 = smov %s562_s11 }
  0x90   : > { %s810_s11 = smov %s646_s21  ;;  %s811_s12 = smov %s570_s13 }
  0x91   : > { %s812_s13 = smov %s814_s16  ;;  %18 = sbr.rel (!%p16_p6) target bundleno = 7 (0x7), region = 91 }
  0x98   :  { %270 = vsyncpa [#allocation4], 1 }
  0x99   :  { %272 = vsyncpa [#allocation4 + $0x1], 1 }
  0x9a   :  { %273 = vsyncpa [#allocation7], 1 }
  0x9b   :  { %275 = vsyncpa [#allocation7 + $0x1], 1 }
  0x9c   :  { %276 = vsyncpa [#allocation5], 1 }
  0x9d   :  { %278 = vsyncpa [#allocation5 + $0x1], 1 }

</bundles_post_ra>
